<compile_context>
chip_gen: v6e
topology: v6e:2x2x1
jax: 0.10.0
libtpu: 0.0.40
codegen_flags: <defaults>
</compile_context>

<pallas_src>
import functools

import jax
import jax.numpy as jnp
from jax.experimental import pallas as pl
from jax.experimental.pallas import tpu as pltpu

_LANES = 128
_SUBLANES = 8
_MAX_SUB_ROWS = 512          # strip-mine chunk: bounds in-kernel f32 temps to ~1.5 MiB


def _wan_loss_kernel(x_ref, t_ref, out_ref, *, gamma, valid_rows, block_rows, sub_rows):
    """One grid step: WAN loss over a (block_rows, 128) tile -> (8, 128) partial."""
    i = pl.program_id(0)
    n_blocks = pl.num_programs(0)
    n_sub = block_rows // sub_rows

    def chunk_partial(j, masked):
        """Loss partial of one (sub_rows, 128) sub-chunk, reduced to (8, 128)."""
        start = pl.multiple_of(j * sub_rows, sub_rows)
        x = x_ref[pl.ds(start, sub_rows), :].astype(jnp.float32)
        t = t_ref[pl.ds(start, sub_rows), :].astype(jnp.float32)

        neg_x = -x
        # softplus(-x) = relu(-x) + log1p(exp(-|x|));  min(x, -x) == -|x|.
        sp = jnp.maximum(neg_x, 0.0) + jnp.log1p(jnp.exp(jnp.minimum(x, neg_x)))
        elem = jnp.where(t == 1.0, 1.0, gamma) * sp + gamma * (x * (1.0 - t))

        if masked:
            # Only the ragged last block masks its Pallas-padded rows.
            row = (i * block_rows + j * sub_rows
                   + jax.lax.broadcasted_iota(jnp.int32, (sub_rows, _LANES), 0))
            elem = jnp.where(row < valid_rows, elem, 0.0)

        # (sub, 128) -> (sub/8, 8, 128): each (8, 128) slab is one native f32
        # tile, so the reshape is layout-free and the axis-0 sum is pure
        # cross-vreg VPU adds.  Result stores as a full-width unmasked (8,128).
        return jnp.sum(elem.reshape(sub_rows // _SUBLANES, _SUBLANES, _LANES), axis=0)

    def run(masked):
        acc0 = jnp.zeros((_SUBLANES, _LANES), jnp.float32)
        out_ref[...] = jax.lax.fori_loop(
            0, n_sub, lambda j, acc: acc + chunk_partial(j, masked), acc0)

    if valid_rows % block_rows != 0:            # static: last block is ragged
        @pl.when(i == n_blocks - 1)
        def _tail():
            run(True)

        @pl.when(i != n_blocks - 1)
        def _body():
            run(False)
    else:
        run(False)


def wan_loss(inputs, targets, *, gamma: float, reduction: str = "mean",
             block_rows: int = 8192):
    """Pallas implementation of WANLoss.forward. Returns a scalar f32."""
    assert inputs.shape == targets.shape
    assert 0.0 <= gamma <= 1.0
    assert reduction in ("sum", "mean")

    numel = int(inputs.size)
    x_flat = inputs.reshape(-1)
    t_flat = targets.reshape(-1)

    rem = numel % _LANES
    main = numel - rem
    rows = main // _LANES

    loss = jnp.float32(0.0)

    if rows > 0:
        if rem:
            # Kernel covers the 128-aligned prefix; the tiny tail is handled below.
            x = x_flat[:main].reshape(rows, _LANES)
            t = t_flat[:main].reshape(rows, _LANES)
        else:
            x = x_flat.reshape(rows, _LANES)        # free reshape, no copy
            t = t_flat.reshape(rows, _LANES)

        # --- tile sizing -----------------------------------------------------
        cap = ((rows + _SUBLANES - 1) // _SUBLANES) * _SUBLANES
        br = max(_SUBLANES, (int(block_rows) // _SUBLANES) * _SUBLANES)
        if rows > _SUBLANES:
            # Guarantee >= 2 grid blocks so a "parallel" grid feeds both v7x TCs.
            half = ((pl.cdiv(rows, 2) + _SUBLANES - 1) // _SUBLANES) * _SUBLANES
            br = min(br, half)
        br = min(br, cap)
        sub = br if br <= _MAX_SUB_ROWS else _MAX_SUB_ROWS
        br = max(sub, (br // sub) * sub)            # br is a multiple of sub
        n_blocks = pl.cdiv(rows, br)

        kernel = functools.partial(
            _wan_loss_kernel, gamma=float(gamma),
            valid_rows=rows, block_rows=br, sub_rows=sub)

        in_bytes = x.dtype.itemsize + t.dtype.itemsize
        cost = pl.CostEstimate(
            flops=12 * main,
            transcendentals=2 * main,
            bytes_accessed=main * in_bytes + n_blocks * _SUBLANES * _LANES * 4)

        partials = pl.pallas_call(
            kernel,
            out_shape=jax.ShapeDtypeStruct((n_blocks * _SUBLANES, _LANES), jnp.float32),
            grid=(n_blocks,),
            in_specs=[
                pl.BlockSpec((br, _LANES), lambda i: (i, 0)),
                pl.BlockSpec((br, _LANES), lambda i: (i, 0)),
            ],
            out_specs=pl.BlockSpec((_SUBLANES, _LANES), lambda i: (i, 0)),
            compiler_params=pltpu.CompilerParams(
                dimension_semantics=("parallel",),
                vmem_limit_bytes=48 * 1024 * 1024),
            cost_estimate=cost,
        )(x, t)

        # Tiny (n_blocks x 1 KiB) cross-block / cross-lane reduction.
        loss = loss + jnp.sum(partials)

    if rem:
        # < 128 trailing elements: negligible work, pure JAX (avoids the O(N)
        # pad/concatenate copy for odd-sized inputs).
        xr = x_flat[main:].astype(jnp.float32)
        tr = t_flat[main:].astype(jnp.float32)
        sp = jnp.maximum(-xr, 0.0) + jnp.log1p(jnp.exp(-jnp.abs(xr)))
        loss = loss + jnp.sum(jnp.where(tr == 1.0, 1.0, gamma) * sp
                              + gamma * (xr * (1.0 - tr)))

    if reduction == "mean":
        loss = loss / jnp.float32(numel)
    return loss


def _wan_loss_ref(inputs, targets, gamma, reduction):
    """Pure-JAX reference mirroring the PyTorch module."""
    x = inputs.astype(jnp.float32)
    t = targets.astype(jnp.float32)
    log_term = jnp.log1p(jnp.exp(-jnp.abs(x)))
    pos = jnp.maximum(x, 0.0) - x + log_term                           # BCE(x, 1)
    neg = gamma * (jnp.maximum(-x, 0.0) + x * (1.0 - t) + log_term)    # g*BCE(-x, 1-t)
    elem = jnp.where(t == 1.0, pos, neg)
    s = jnp.sum(elem)
    return s if reduction == "sum" else s / x.size


if __name__ == "__main__":
    key = jax.random.PRNGKey(0)
    k1, k2, k3, k4 = jax.random.split(key, 4)
    gamma = 0.25

    # Main example: multi-label-style logits and {0,1} targets of identical shape.
    shape = (2, 4, 16, 16)
    x = jax.random.normal(k1, shape, dtype=jnp.float32) * 2.0
    t = jax.random.bernoulli(k2, p=0.3, shape=shape).astype(jnp.float32)
    for reduction in ("mean", "sum"):
        out = jax.block_until_ready(wan_loss(x, t, gamma=gamma, reduction=reduction))
        ref = _wan_loss_ref(x, t, gamma, reduction)
        assert jnp.allclose(out, ref, rtol=1e-5, atol=1e-5), (reduction, out, ref)

    # Odd-sized example: exercises the ragged-tail mask, the >=2-block split,
    # and the pure-JAX <128-element remainder path (no pad copy).
    shape2 = (3, 5, 7, 11)   # 1155 elements: numel % 128 != 0, rows % block != 0
    x2 = jax.random.normal(k3, shape2, dtype=jnp.float32)
    t2 = jax.random.bernoulli(k4, p=0.5, shape=shape2).astype(jnp.float32)
    for reduction in ("mean", "sum"):
        out2 = jax.block_until_ready(wan_loss(x2, t2, gamma=gamma, reduction=reduction))
        ref2 = _wan_loss_ref(x2, t2, gamma, reduction)
        assert jnp.allclose(out2, ref2, rtol=1e-5, atol=1e-5), (reduction, out2, ref2)

    # Small explicit-tile case to exercise the strip-mined fori_loop with >1 chunk.
    out3 = jax.block_until_ready(
        wan_loss(x2, t2, gamma=gamma, reduction="mean", block_rows=16))
    ref3 = _wan_loss_ref(x2, t2, gamma, "mean")
    assert jnp.allclose(out3, ref3, rtol=1e-5, atol=1e-5), (out3, ref3)

    print("KERNEL_OK")
</pallas_src>

<mosaic_0001>
module attributes {stable_mosaic.version = 11 : i64} {
  func.func @_wan_loss_kernel(%arg0: i32, %arg1: memref<8x128xf32, #tpu.memory_space<vmem>>, %arg2: memref<8x128xf32, #tpu.memory_space<vmem>>, %arg3: memref<8x128xf32, #tpu.memory_space<vmem>>) attributes {dimension_semantics = [#tpu.dimension_semantics<parallel>], iteration_bounds = array<i64: 2>, scalar_prefetch = 0 : i64, scratch_operands = 0 : i64, tpu.core_type = #tpu.core_type<tc>, window_params = [{transform_indices = @transform_0, window_bounds = array<i64: 8, 128>}, {transform_indices = @transform_1, window_bounds = array<i64: 8, 128>}, {transform_indices = @transform_2, window_bounds = array<i64: 8, 128>}]} {
    %cst = arith.constant 0.000000e+00 : f32
    %0 = vector.broadcast %cst : f32 to vector<8x128xf32>
    %c0_i32 = arith.constant 0 : i32
    %c8_i32 = arith.constant 8 : i32
    %1 = arith.muli %c0_i32, %c8_i32 : i32
    %2 = tpu.assume_multiple %1, 8 : i32
    %3 = arith.index_cast %2 : i32 to index
    %c0 = arith.constant 0 : index
    %4 = vector.load %arg1[%3, %c0] : memref<8x128xf32, #tpu.memory_space<vmem>>, vector<8x128xf32>
    %5 = arith.index_cast %2 : i32 to index
    %c0_0 = arith.constant 0 : index
    %6 = vector.load %arg2[%5, %c0_0] : memref<8x128xf32, #tpu.memory_space<vmem>>, vector<8x128xf32>
    %cst_1 = arith.constant 0.000000e+00 : f32
    %7 = vector.broadcast %cst_1 : f32 to vector<8x128xf32>
    %8 = arith.subf %7, %4 : vector<8x128xf32>
    %cst_2 = arith.constant 0.000000e+00 : f32
    %9 = vector.broadcast %cst_2 : f32 to vector<8x128xf32>
    %10 = arith.maximumf %8, %9 : vector<8x128xf32>
    %11 = arith.minimumf %4, %8 : vector<8x128xf32>
    %12 = math.exp %11 : vector<8x128xf32>
    %13 = math.log1p %12 : vector<8x128xf32>
    %14 = arith.addf %10, %13 : vector<8x128xf32>
    %cst_3 = arith.constant 1.000000e+00 : f32
    %15 = vector.broadcast %cst_3 : f32 to vector<8x128xf32>
    %16 = arith.cmpf oeq, %6, %15 : vector<8x128xf32>
    %cst_4 = arith.constant 1.000000e+00 : f32
    %cst_5 = arith.constant 2.500000e-01 : f32
    %17 = vector.broadcast %cst_4 : f32 to vector<8x128xf32>
    %18 = vector.broadcast %cst_5 : f32 to vector<8x128xf32>
    %19 = arith.select %16, %17, %18 : vector<8x128xi1>, vector<8x128xf32>
    %20 = arith.mulf %19, %14 : vector<8x128xf32>
    %cst_6 = arith.constant 1.000000e+00 : f32
    %21 = vector.broadcast %cst_6 : f32 to vector<8x128xf32>
    %22 = arith.subf %21, %6 : vector<8x128xf32>
    %23 = arith.mulf %4, %22 : vector<8x128xf32>
    %cst_7 = arith.constant 2.500000e-01 : f32
    %24 = vector.broadcast %cst_7 : f32 to vector<8x128xf32>
    %25 = arith.mulf %24, %23 : vector<8x128xf32>
    %26 = arith.addf %20, %25 : vector<8x128xf32>
    %27 = vector.shape_cast %26 : vector<8x128xf32> to vector<1x8x128xf32>
    %cst_8 = arith.constant dense<0.000000e+00> : vector<8x128xf32>
    %28 = vector.multi_reduction <add>, %27, %cst_8 [0] : vector<1x8x128xf32> to vector<8x128xf32>
    %29 = arith.addf %0, %28 : vector<8x128xf32>
    %c1_i32 = arith.constant 1 : i32
    %c0_9 = arith.constant 0 : index
    %c0_10 = arith.constant 0 : index
    %30 = vector.load %arg3[%c0_9, %c0_10] : memref<8x128xf32, #tpu.memory_space<vmem>>, vector<8x128xf32>
    tpu.vector_store %arg3[%c0_9, %c0_10], %29 {strides = array<i32>} : memref<8x128xf32, #tpu.memory_space<vmem>>, vector<8x128xf32>,
    return
  }
  func.func @transform_0(%arg0: i32) -> (i32, i32) {
    %c0_i32 = arith.constant 0 : i32
    %c0_i32_0 = arith.constant 0 : i32
    return %arg0, %c0_i32 : i32, i32
  }
  func.func @transform_1(%arg0: i32) -> (i32, i32) {
    %c0_i32 = arith.constant 0 : i32
    %c0_i32_0 = arith.constant 0 : i32
    return %arg0, %c0_i32 : i32, i32
  }
  func.func @transform_2(%arg0: i32) -> (i32, i32) {
    %c0_i32 = arith.constant 0 : i32
    %c0_i32_0 = arith.constant 0 : i32
    return %arg0, %c0_i32 : i32, i32
  }
}

</mosaic_0001>

<bundles_post_ra>
// kernel: tpu_custom_call.1
= control target key start
LH: loop header
LB: loop body
LE: loop exit
PB: predicated region body
PF: predicated region fallthrough
CT: control target
= control target key end

     0   :  { %7 = vsyncpa [#allocation3], 0  ;;  %s745_s0 = inlined_call_operand.hbm [shape: f32[16,128], index: 0, kind: input, shape index: {}]   ;;  %s746_s1 = inlined_call_operand.hbm [shape: f32[16,128], index: 1, kind: input, shape index: {}]   ;;  %s747_s2 = inlined_call_operand.hbm [shape: f32[16,128], index: 2, kind: output, shape index: {}]  }
   0x1   :  { %9 = vsyncpa [#allocation3 + $0x1], 0 }
   0x2   :  { %10 = vsyncpa [#allocation6], 0 }
   0x3   :  { %12 = vsyncpa [#allocation6 + $0x1], 0 }
   0x4   :  { %13 = vsyncpa [#allocation4], 0 }
   0x5   :  { %15 = vsyncpa [#allocation4 + $0x1], 0  ;;  %s546_s9 = smov 0   ;;  %s548_s10 = smov 0  }
   0x6   :  { %s550_s11 = smov 0   ;;  %s552_s12 = smov 0  }
   0x7 LB: > { %s567_s13 = sadd.s32 4294967295, %s525_s12   ;;  %s330_s14 = sadd.s32 4294967294, %s525_s12   ;;  %s525_s12 = sphi %s552_s12, %s766_s12   ;;  %s521_s11 = sphi %s550_s11, %s765_s11   ;;  %s517_s10 = sphi %s548_s10, %s764_s10   ;;  %s513_s9 = sphi %s546_s9, %s763_s9  }
   0x8   : > { %s571_s15 = sadd.s32 1, %s525_s12   ;;  %s28_s16 = sadd.s32 1, %s521_s11 }
   0x9   : > { %s25_s17 = ssub.s32 %s525_s12, %s571_s15  ;;  %p35_p0 = scmp.ne.s32.totalorder %s521_s11, %s517_s10 }
   0xa   : > { %p26_p1 = scmp.eq.s32.totalorder %s25_s17, 0  ;;  %p36_p2 = scmp.eq.s32.totalorder %s525_s12, 0 }
   0xb   : > { %p41_p3 = scmp.ne.s32.totalorder %s517_s10, %s513_s9  ;;  %p42_p4 = scmp.eq.s32.totalorder %s567_s13, 0 }
   0xc   : > { %s583_s18 = scalar_select %p26_p1, %s521_s11, %s28_s16  }
   0xd   : > { %p585_p5 = por %p36_p2, %p35_p0  ;;  %p589_p6 = por %p42_p4, %p41_p3 }
   0xe   : > { %p91_p7 = scmp.eq.s32.totalorder %s567_s13, 1  ;;  %p97_p8 = scmp.eq.s32.totalorder %s330_s14, 1 }
   0xf   : > { %s751_s20 = scalar_select %p589_p6, 1, 0 }
  0x10   : > { %p362_p10 = scmp.lt.s32.totalorder %s525_s12, 2  ;;  %p596_p11 = por %p91_p7, %p35_p0 }
  0x11   : > { %p600_p12 = por %p97_p8, %p41_p3  ;;  %s605_s23 = sand.u32 1, %s521_s11  }
  0x12   : > { %s752_s21 = scalar_select %p596_p11, 1, 0 }
  0x13   : > { %s753_s22 = scalar_select %p600_p12, 1, 0 }
  0x14   : > { %s334_s24 = sshll.u32 %s525_s12, 7  ;;  %s333_s25 = sshll.u32 %s605_s23, 3 }
  0x15   : > { %s614_s28 = scalar_lea.hbm %s745_s0, %s334_s24  ;;  %s121_s29 = scalar_lea.vmem [#allocation2], %s333_s25 }
  0x16   : > { %s128_s30 = sshll.u32 %s121_s29, 4  ;;  %p620_p13 = pnand %p362_p10, %p585_p5  ;;  %s624_s30 = int_to_ptr.vmem [resolvable:$true] %s128_s30 }
  0x17   : > { %s118_s4 = scalar_lea.sflag [#allocation3], %s605_s23  ;;  %s401_s5 = scalar_lea.hbm %s614_s28, 128 }
  0x18   : > { %p402_p2 = scmp.ne.s32.totalorder %s614_s28, %s401_s5  ;;  %p403_p3 = pneg %p620_p13 }
  0x19   : > { %s406_s8 = scalar_lea.hbm %s745_s0, 256  ;;  %p407_p5 = scmp.lt.s32.totalorder %s614_s28, %s745_s0 }
  0x1a   : > { %p404_p4 = pnand %p403_p3, %p402_p2  ;;  %p408_p8 = scmp.lt.s32.totalorder %s406_s8, %s401_s5 }
  0x1c   : > { %p405_p7 = pneg %p404_p4  ;;  %p409_p10 = por %p408_p8, %p407_p5 }
  0x1e   : > { %p410_p9 = pnand %p409_p10, %p405_p7 }
  0x20   : > { %413 = shalt.err (!%p410_p9)
}
  0x21   : > { %s414_s17 = scalar_lea.vmem %s624_s30, 128  ;;  %s527_s19 = smov [#allocation2]  }
  0x22   : > { %p415_p0 = scmp.ne.s32.totalorder %s624_s30, %s414_s17  ;;  %s419_s26 = sshll.u32 %s527_s19, 4  ;;  %s420_s26 = int_to_ptr.vmem [resolvable:$false] %s419_s26 }
  0x23   : > { %s421_s27 = scalar_lea.vmem %s420_s26, 256  ;;  %p422_p1 = scmp.lt.s32.totalorder %s624_s30, %s420_s26 }
  0x24   : > { %p417_p2 = pnand %p415_p0, %p403_p3  ;;  %p423_p12 = scmp.lt.s32.totalorder %s421_s27, %s414_s17 }
  0x26   : > { %p418_p4 = pneg %p417_p2  ;;  %p424_p11 = por %p423_p12, %p422_p1 }
  0x28   : > { %p425_p5 = pnand %p424_p11, %p418_p4 }
  0x2a   : > { %428 = shalt.err (!%p425_p5)
}
  0x2b   : > { %354 = dma.hbm_to_vmem [thread:$0]  (!%p620_p13), %s614_s28, 128, %s624_s30, %s118_s4  }
  0x2c   : > { %p755_p9 = scmp.lt.s32.totalorder %s525_s12, 3  ;;  %p756_p0 = scmp.ge.s32.totalorder %s525_s12, 1 }
  0x2d   : > { %s666_s7 = scalar_lea.hbm %s746_s1, %s334_s24  ;;  %s139_s8 = scalar_lea.vmem [#allocation5], %s333_s25 }
  0x2e   : > { %p657_p7 = pnand %p756_p0, %p755_p9  ;;  %s146_s14 = sshll.u32 %s139_s8, 4  ;;  %s147_s14 = int_to_ptr.vmem [resolvable:$true] %s146_s14 }
  0x2f   : > { %s136_s28 = scalar_lea.sflag [#allocation6], %s605_s23  ;;  %s429_s30 = scalar_lea.hbm %s666_s7, 128 }
  0x30   : > { %s757_s29 = scalar_select %p657_p7, 1, 0 }
  0x31   : > { %p430_p11 = scmp.ne.s32.totalorder %s666_s7, %s429_s30  ;;  %s434_s17 = scalar_lea.hbm %s746_s1, 256 }
  0x32   : > { %p435_p8 = scmp.lt.s32.totalorder %s666_s7, %s746_s1  ;;  %p436_p10 = scmp.lt.s32.totalorder %s434_s17, %s429_s30 }
  0x33   : > { %p432_p12 = pnand %p430_p11, %p403_p3 }
  0x34   : > { %p437_p2 = por %p436_p10, %p435_p8 }
  0x35   : > { %p433_p1 = pneg %p432_p12 }
  0x37   : > { %p438_p4 = pnand %p437_p2, %p433_p1 }
  0x39   : > { %441 = shalt.err (!%p438_p4)
}
  0x3a   : > { %s442_s25 = scalar_lea.vmem %s147_s14, 128  ;;  %s528_s23 = smov [#allocation5]  }
  0x3b   : > { %p443_p5 = scmp.ne.s32.totalorder %s147_s14, %s442_s25  ;;  %s447_s26 = sshll.u32 %s528_s23, 4  ;;  %s448_s26 = int_to_ptr.vmem [resolvable:$false] %s447_s26 }
  0x3c   : > { %s449_s27 = scalar_lea.vmem %s448_s26, 256  ;;  %p450_p11 = scmp.lt.s32.totalorder %s147_s14, %s448_s26 }
  0x3d   : > { %p445_p9 = pnand %p443_p5, %p403_p3  ;;  %p451_p12 = scmp.lt.s32.totalorder %s449_s27, %s442_s25 }
  0x3f   : > { %p446_p0 = pneg %p445_p9  ;;  %p452_p6 = por %p451_p12, %p450_p11 }
  0x41   : > { %p453_p7 = pnand %p452_p6, %p446_p0 }
  0x43   : > { %456 = shalt.err (!%p453_p7)
}
  0x44   : > { %357 = dma.hbm_to_vmem [thread:$0]  (!%p620_p13), %s666_s7, 128, %s147_s14, %s136_s28  }
  0x45   : > { %p758_p1 = scmp.ne.s32.totalorder %s757_s29, 0 }
  0x46   : > { %s692_s5 = sand.u32 (!%p758_p1), 1, %s517_s10   ;;  %p759_p6 = scmp.ne.s32.totalorder (!%p758_p1), %s751_s20, 0 }
  0x47   : > { %155 = sbr.rel (%p758_p1) target bundleno = 138 (0x8a), region = 28  ;;  %s695_s6 = sshll.u32 (!%p758_p1), %s692_s5, 3 }
  0x48   : > { %s158_s8 = scalar_lea.sflag (!%p758_p1), [#allocation3], %s692_s5  ;;  %s161_s30 = scalar_lea.vmem (!%p758_p1), [#allocation2], %s695_s6 }
  0x4c   : > { %500 = dma.done.wait (%p759_p6), %s158_s8, 128  }
  0x4d   : > { %502 = vsyncadd (%p759_p6), %s158_s8, 4294967168  ;;  %s167_s3 = scalar_lea.sflag [#allocation6], %s692_s5  ;;  %s170_s29 = scalar_lea.vmem [#allocation5], %s695_s6 }
  0x4e   : > { %504 = dma.done.wait (%p759_p6), %s167_s3, 128  }
  0x4f   : > { %506 = vsyncadd (%p759_p6), %s167_s3, 4294967168  ;;  %v196_v0 = vld [vmem:[%s161_s30] sm:$0xff]  ;;  %v197_v7 = vld [vmem:[%s170_s29] sm:$0xff]  ;;  %v529_v17 = vmov 0.25   ;;  %s195_s20 = scalar_lea.vmem [#allocation7], %s695_s6  ;;  %s342_s14 = sshll.u32 %s567_s13, 7 }
  0x50   : > { %v198_v1 = vsub.f32 0.0, %v196_v0  ;;  %v216_v10 = vsub.f32 1.0, %v197_v7  ;;  %vm213_vm1 = vcmp.eq.f32.partialorder %v197_v7, 1.0  ;;  %s237_s7 = sshll.u32 %s195_s20, 4  ;;  %s235_s16 = scalar_lea.hbm %s747_s2, %s342_s14  ;;  %s238_s7 = int_to_ptr.vmem [resolvable:$true] %s237_s7 }
  0x51   : > { %v214_v18 = vsel %vm213_vm1, 1.0, %v529_v17  ;;  %s224_s17 = scalar_lea.sflag [#allocation4], %s692_s5  ;;  %s457_s24 = scalar_lea.vmem %s238_s7, 128 }
  0x52   : > { %v200_v2 = vmin.f32 %v196_v0, %v198_v1  ;;  %v199_v13 = vmax.f32 %v198_v1, 0.0  ;;  %v217_v14 = vmul.f32 %v216_v10, %v196_v0  ;;  %p458_p13 = scmp.ne.s32.totalorder %s238_s7, %s457_s24  ;;  %p760_p3 = scmp.ne.s32.totalorder %s752_s21, 0 }
  0x53   : > { %s530_s19 = smov [#allocation7]  }
  0x54   : > { %v201_v3 = vmul.f32 1.442695, %v200_v2  ;;  %v218_v20 = vmul.f32 0.25, %v217_v14  ;;  %p459_p7 = pnand %p458_p13, %p760_p3  ;;  %s461_s25 = sshll.u32 %s530_s19, 4  ;;  %s462_s25 = int_to_ptr.vmem [resolvable:$false] %s461_s25 }
  0x55   : > { %s463_s23 = scalar_lea.vmem %s462_s25, 256  ;;  %p464_p10 = scmp.lt.s32.totalorder %s238_s7, %s462_s25 }
  0x56   : > { %397 = vpow2.f32 %v201_v3  ;;  %p460_p8 = pneg %p459_p7  ;;  %p465_p2 = scmp.lt.s32.totalorder %s463_s23, %s457_s24 }
  0x58   : > { %p466_p4 = por %p465_p2, %p464_p10 }
  0x5a   : > { %p467_p5 = pnand %p466_p4, %p460_p8 }
  0x63   : > { %v398_v4 = vpop.eup %397 }
  0x64   : > { %v203_v5 = vadd.f32 1.0, %v398_v4  ;;  %v206_v6 = vmul.f32 -0.5, %v398_v4  ;;  %v209_v9 = vand.u32 2147483647, %v398_v4 }
  0x66   : > { %399 = vlog2.f32 %v203_v5  ;;  %v207_v8 = vadd.f32 1.0, %v206_v6  ;;  %vm210_vm0 = vcmp.lt.f32.partialorder %v209_v9, 0.0004427343 }
  0x68   : > { %v208_v11 = vmul.f32 %v398_v4, %v207_v8 }
  0x73   : > { %v400_v12 = vpop.eup %399 }
  0x74   : > { %v205_v15 = vmul.f32 0.6931472, %v400_v12 }
  0x76   : > { %v211_v16 = vsel %vm210_vm0, %v208_v11, %v205_v15 }
  0x77   : > { %v212_v19 = vadd.f32 %v211_v16, %v199_v13 }
  0x79   : > { %v215_v21 = vmul.f32 %v214_v18, %v212_v19 }
  0x7b   : > { %v219_v22 = vadd.f32 %v218_v20, %v215_v21 }
  0x7d   : > { %222 = vst [vmem:[%s195_s20] sm:$0xff] %v219_v22 }
  0x7e   : > { %470 = shalt.err (!%p467_p5)
}
  0x7f   : > { %s471_s13 = scalar_lea.hbm %s235_s16, 128  ;;  %s475_s5 = scalar_lea.hbm %s747_s2, 256 }
  0x80   : > { %p472_p9 = scmp.ne.s32.totalorder %s235_s16, %s471_s13  ;;  %p476_p12 = scmp.lt.s32.totalorder %s235_s16, %s747_s2 }
  0x81   : > { %p477_p1 = scmp.lt.s32.totalorder %s475_s5, %s471_s13 }
  0x82   : > { %p473_p0 = pnand %p472_p9, %p760_p3 }
  0x83   : > { %p478_p6 = por %p477_p1, %p476_p12 }
  0x84   : > { %p474_p11 = pneg %p473_p0 }
  0x86   : > { %p479_p13 = pnand %p478_p6, %p474_p11 }
  0x88   : > { %482 = shalt.err (!%p479_p13)
}
  0x89   : > { %349 = dma.vmem_to_hbm [thread:$0]  (%p760_p3), %s238_s7, 128, %s235_s16, %s224_s17  }
  0x8a PF: > { %s249_s30 = sand.u32 1, %s513_s9   ;;  %p761_p7 = scmp.ne.s32.totalorder %s753_s22, 0 }
  0x8b   : > { %p762_p8 = scmp.ge.s32.totalorder %s525_s12, 2  ;;  %s250_s3 = scalar_lea.sflag [#allocation4], %s249_s30 }
  0x8d   : > { %p359_p10 = pnand %p762_p8, %p761_p7 }
  0x8f   : > { %p360_p2 = pneg %p359_p10 }
  0x91   : > { %508 = dma.done.wait (%p360_p2), %s250_s3, 128  }
  0x92   : > { %510 = vsyncadd (%p360_p2), %s250_s3, 4294967168  ;;  %p18_p4 = scmp.ge.s32.totalorder %s571_s15, 4   ;;  %s763_s9 = smov %s517_s10 }
  0x93   : > { %s764_s10 = smov %s521_s11  ;;  %s765_s11 = smov %s583_s18 }
  0x94   : > { %s766_s12 = smov %s571_s15  ;;  %20 = sbr.rel (!%p18_p4) target bundleno = 7 (0x7), region = 86 }
  0x99   :  { %255 = vsyncpa [#allocation3], 1 }
  0x9a   :  { %257 = vsyncpa [#allocation3 + $0x1], 1 }
  0x9b   :  { %258 = vsyncpa [#allocation6], 1 }
  0x9c   :  { %260 = vsyncpa [#allocation6 + $0x1], 1 }
  0x9d   :  { %261 = vsyncpa [#allocation4], 1 }
  0x9e   :  { %263 = vsyncpa [#allocation4 + $0x1], 1 }

</bundles_post_ra>
